<compile_context>
chip_gen: v5e
topology: v5e:2x2
jax: 0.10.0
libtpu: 0.0.40
codegen_flags: <defaults>
</compile_context>

<pallas_src>
import math

import jax
import jax.numpy as jnp
from jax.experimental import pallas as pl
from jax.experimental.pallas import tpu as pltpu


def _round_up(x, m):
    return (x + m - 1) // m * m


def _make_popart_kernel(k_rem):
    """k_rem != 0  <=>  In % tk != 0 with a K grid: mask the ragged last K block."""

    def kernel(x_ref, w_ref, b_ref, o_ref):
        # x_ref : [tm, tk]   (VMEM)  activations
        # w_ref : [tk, tn]   (VMEM)  weight already transposed to [In, Out]
        # b_ref : [1,  tn]   (VMEM)  bias (f32)
        # o_ref : [tm, tn]   (VMEM, f32) resident across the K axis -> accumulator
        k = pl.program_id(2)

        x = x_ref[...]
        w = w_ref[...]
        if k_rem:
            # Garbage lanes of the partial last K block would corrupt the
            # accumulation -> zero both operands there (cheap VPU selects).
            not_last = k < pl.num_programs(2) - 1
            kx = jax.lax.broadcasted_iota(jnp.int32, x.shape, 1)
            x = jnp.where(jnp.logical_or(not_last, kx < k_rem), x, 0)
            kw = jax.lax.broadcasted_iota(jnp.int32, w.shape, 0)
            w = jnp.where(jnp.logical_or(not_last, kw < k_rem), w, 0)

        @pl.when(k == 0)
        def _init():
            # Bias-initialise the resident f32 output tile; every K step then
            # accumulates straight into it (no scratch, no epilogue pass).
            o_ref[...] = jnp.zeros_like(o_ref) + b_ref[...]

        o_ref[...] += jnp.dot(x, w, preferred_element_type=jnp.float32)

    return kernel


def _choose_tiles(B, In, Out, itemsize):
    """Pick (tm, tn, tk) obeying the (8,128) rules and a ~10 MiB VMEM budget."""
    sub = 8 if itemsize == 4 else 16          # sublane granule (f32 / bf16)
    lane = 128

    # N: full Out when small (typical PopArt value head), else 256-lane tiles.
    tn = Out if Out <= 512 else 256
    # K: full In when modest -> single K block, no accumulation loop at all.
    tk = In if In <= 2048 else 512

    tnp = _round_up(tn, lane)
    tkp = _round_up(tk, lane)

    # M: largest tile that keeps (double-buffered x + weight + bias + f32 out)
    # under ~10 MiB, so defaults fit every generation's scoped-VMEM limit.
    budget = 10 * 1024 * 1024
    fixed = 2 * itemsize * tkp * tnp + 2 * 4 * 8 * tnp            # weight + bias
    per_row = 2 * itemsize * tkp + 2 * 4 * tnp                    # x row + out row
    tm = max(sub, (budget - fixed) // per_row)
    tm = min(tm, 1024)
    # v7x megacore: keep >= 2 blocks along the "parallel" M axis when possible.
    tm = min(tm, _round_up(pl.cdiv(B, 2), sub))

    if tm >= B:
        tm = B                                  # one full-extent block
    else:
        tm = max(sub, (tm // sub) * sub)        # multiple of the sublane granule
    return tm, tn, tk


def popart_forward(x, weight, bias):
    """F.linear(x.float(), weight.float(), bias.float()) as a Pallas TPU kernel.

    x: [B, In]; weight: [Out, In] (PyTorch layout); bias: [Out].
    Returns float32 [B, Out].
    """
    # Unified dtype policy (single MXU path, no per-tile casts): bf16 only if
    # both operands already are; otherwise f32 like PyTorch's .float().
    if x.dtype == jnp.bfloat16 and weight.dtype == jnp.bfloat16:
        in_dtype = jnp.bfloat16
    else:
        in_dtype = jnp.float32
    x = x.astype(in_dtype)
    # One wrapper-side transpose of the (small) weight puts the contraction on
    # the sublane axis of the RHS -> plain [M,K]@[K,N] matmul in the kernel.
    w_t = weight.astype(in_dtype).T                     # [In, Out]
    bias2d = bias.astype(jnp.float32).reshape(1, -1)    # [1, Out]

    B, In = x.shape
    In_w, Out = w_t.shape
    assert In == In_w, (In, In_w)

    tm, tn, tk = _choose_tiles(B, In, Out, jnp.dtype(in_dtype).itemsize)
    grid = (pl.cdiv(B, tm), pl.cdiv(Out, tn), pl.cdiv(In, tk))
    k_rem = In % tk if grid[2] > 1 else 0    # ragged last K block -> mask in kernel

    flops = 2 * B * In * Out
    bytes_accessed = (x.size * x.dtype.itemsize * grid[1]          # x re-read per j
                      + w_t.size * w_t.dtype.itemsize * grid[0]    # w re-read per i
                      + bias2d.size * 4 * grid[0]
                      + B * Out * 4)

    # TODO(synk): if a v7x profile shows exposed DMA waits in the skinny-Out
    # streaming case, bump the x BlockSpec to pipeline_mode=pl.Buffered(3).
    return pl.pallas_call(
        _make_popart_kernel(k_rem),
        out_shape=jax.ShapeDtypeStruct((B, Out), jnp.float32),
        grid_spec=pltpu.PrefetchScalarGridSpec(
            num_scalar_prefetch=0,
            grid=grid,
            in_specs=[
                pl.BlockSpec((tm, tk), lambda i, j, k: (i, k)),   # x tile
                pl.BlockSpec((tk, tn), lambda i, j, k: (k, j)),   # weight.T tile
                pl.BlockSpec((1, tn), lambda i, j, k: (0, j)),    # bias tile
            ],
            out_specs=pl.BlockSpec((tm, tn), lambda i, j, k: (i, j)),
        ),
        compiler_params=pltpu.CompilerParams(
            dimension_semantics=("parallel", "parallel", "arbitrary")),
        cost_estimate=pl.CostEstimate(
            flops=flops, transcendentals=0, bytes_accessed=bytes_accessed),
    )(x, w_t, bias2d)


def init_popart_params(key, input_shape, output_shape):
    """Deterministic init mirroring PopArt.reset_parameters()."""
    kw, kb = jax.random.split(key)
    # kaiming_uniform_(a=sqrt(5)) on [Out, In]  ->  bound = 1/sqrt(fan_in)
    bound = 1.0 / math.sqrt(input_shape)
    weight = jax.random.uniform(
        kw, (output_shape, input_shape), jnp.float32, -bound, bound)
    bias = jax.random.uniform(
        kb, (output_shape,), jnp.float32, -bound, bound)
    return weight, bias
    # TODO(synk): update()/normalize()/denormalize() maintain float64 running
    # stats with in-place parameter rescaling -- stateful bookkeeping outside
    # the forward hot path, intentionally not turned into a Pallas kernel.


if __name__ == "__main__":
    key = jax.random.PRNGKey(0)
    ks = jax.random.split(key, 6)

    def ref_linear(x, w, b):
        return jnp.einsum("bi,oi->bo", x, w,
                          precision=jax.lax.Precision.HIGHEST) + b

    # 1) tiny shape consistent with the module's usual construction -----------
    B, In, Out = 8, 32, 4
    x = jax.random.normal(ks[0], (B, In), jnp.float32)
    w, b = init_popart_params(ks[1], In, Out)
    out = popart_forward(x, w, b)
    jax.block_until_ready(out)
    assert out.shape == (B, Out) and out.dtype == jnp.float32
    assert jnp.allclose(out, ref_linear(x, w, b), atol=2e-2, rtol=2e-2), \
        "tiny-shape mismatch"

    # 2) canonical PopArt value head: big batch, Out=1, single streaming pass
    #    over x; also exercises a partial last M block (B not tile-aligned). --
    B, In, Out = 1000, 256, 1
    x = jax.random.normal(ks[2], (B, In), jnp.float32)
    w, b = init_popart_params(ks[3], In, Out)
    out = popart_forward(x, w, b)
    jax.block_until_ready(out)
    assert out.shape == (B, Out)
    assert jnp.allclose(out, ref_linear(x, w, b), atol=2e-2, rtol=2e-2), \
        "value-head mismatch"

    # 3) large-In path: K grid + in-kernel mask of the ragged last K block ----
    B, In, Out = 64, 2304, 80
    x = jax.random.normal(ks[4], (B, In), jnp.float32)
    w, b = init_popart_params(ks[5], In, Out)
    out = popart_forward(x, w, b)
    jax.block_until_ready(out)
    assert out.shape == (B, Out)
    assert jnp.allclose(out, ref_linear(x, w, b), atol=3e-2, rtol=3e-2), \
        "K-tiled mismatch"

    print("KERNEL_OK")
</pallas_src>

<mosaic_0001>
module attributes {stable_mosaic.version = 11 : i64} {
  func.func @kernel(%arg0: i32, %arg1: i32, %arg2: i32, %arg3: memref<8x32xf32, #tpu.memory_space<vmem>>, %arg4: memref<32x4xf32, #tpu.memory_space<vmem>>, %arg5: memref<1x4xf32, #tpu.memory_space<vmem>>, %arg6: memref<8x4xf32, #tpu.memory_space<vmem>>) attributes {dimension_semantics = [#tpu.dimension_semantics<parallel>, #tpu.dimension_semantics<parallel>, #tpu.dimension_semantics<arbitrary>], iteration_bounds = array<i64: 1, 1, 1>, scalar_prefetch = 0 : i64, scratch_operands = 0 : i64, tpu.core_type = #tpu.core_type<tc>, window_params = [{transform_indices = @transform_0, window_bounds = array<i64: 8, 32>}, {transform_indices = @transform_1, window_bounds = array<i64: 32, 4>}, {transform_indices = @transform_2, window_bounds = array<i64: 1, 4>}, {transform_indices = @transform_3, window_bounds = array<i64: 8, 4>}]} {
    %c0 = arith.constant 0 : index
    %c0_0 = arith.constant 0 : index
    %0 = vector.load %arg3[%c0, %c0_0] : memref<8x32xf32, #tpu.memory_space<vmem>>, vector<8x32xf32>
    %c0_1 = arith.constant 0 : index
    %c0_2 = arith.constant 0 : index
    %1 = vector.load %arg4[%c0_1, %c0_2] : memref<32x4xf32, #tpu.memory_space<vmem>>, vector<32x4xf32>
    %c0_i32 = arith.constant 0 : i32
    %2 = arith.cmpi eq, %arg2, %c0_i32 : i32
    %3 = arith.extui %2 : i1 to i32
    %c0_i32_3 = arith.constant 0 : i32
    %4 = arith.cmpi ne, %3, %c0_i32_3 : i32
    scf.if %4 {
      %cst_8 = arith.constant 0.000000e+00 : f32
      %9 = vector.broadcast %cst_8 : f32 to vector<8x4xf32>
      %c0_9 = arith.constant 0 : index
      %c0_10 = arith.constant 0 : index
      %10 = vector.load %arg5[%c0_9, %c0_10] : memref<1x4xf32, #tpu.memory_space<vmem>>, vector<1x4xf32>
      %11 = vector.broadcast %10 : vector<1x4xf32> to vector<8x4xf32>
      %12 = arith.addf %9, %11 : vector<8x4xf32>
      %c0_11 = arith.constant 0 : index
      %c0_12 = arith.constant 0 : index
      %13 = vector.load %arg6[%c0_11, %c0_12] : memref<8x4xf32, #tpu.memory_space<vmem>>, vector<8x4xf32>
      tpu.vector_store %arg6[%c0_11, %c0_12], %12 {strides = array<i32>} : memref<8x4xf32, #tpu.memory_space<vmem>>, vector<8x4xf32>,
    } else {
    }
    %c0_4 = arith.constant 0 : index
    %c0_5 = arith.constant 0 : index
    %5 = vector.load %arg6[%c0_4, %c0_5] : memref<8x4xf32, #tpu.memory_space<vmem>>, vector<8x4xf32>
    %cst = arith.constant dense<0.000000e+00> : vector<8x4xf32>
    %6 = tpu.matmul %0, %1, %cst {dimension_numbers = #tpu.dot_dimension_numbers<[1], [0], [0], [1], [0, 0, 1, 1], [], []>} : vector<8x32xf32>, vector<32x4xf32>, vector<8x4xf32> -> vector<8x4xf32>
    %7 = arith.addf %5, %6 : vector<8x4xf32>
    %c0_6 = arith.constant 0 : index
    %c0_7 = arith.constant 0 : index
    %8 = vector.load %arg6[%c0_6, %c0_7] : memref<8x4xf32, #tpu.memory_space<vmem>>, vector<8x4xf32>
    tpu.vector_store %arg6[%c0_6, %c0_7], %7 {strides = array<i32>} : memref<8x4xf32, #tpu.memory_space<vmem>>, vector<8x4xf32>,
    return
  }
  func.func @transform_0(%arg0: i32, %arg1: i32, %arg2: i32) -> (i32, i32) {
    %c0_i32 = arith.constant 0 : i32
    return %arg0, %arg2 : i32, i32
  }
  func.func @transform_1(%arg0: i32, %arg1: i32, %arg2: i32) -> (i32, i32) {
    %c0_i32 = arith.constant 0 : i32
    return %arg2, %arg1 : i32, i32
  }
  func.func @transform_2(%arg0: i32, %arg1: i32, %arg2: i32) -> (i32, i32) {
    %c0_i32 = arith.constant 0 : i32
    %c0_i32_0 = arith.constant 0 : i32
    return %c0_i32, %arg1 : i32, i32
  }
  func.func @transform_3(%arg0: i32, %arg1: i32, %arg2: i32) -> (i32, i32) {
    %c0_i32 = arith.constant 0 : i32
    return %arg0, %arg1 : i32, i32
  }
}

</mosaic_0001>

<bundles_post_ra>
// kernel: tpu_custom_call.1
= control target key start
LH: loop header
LB: loop body
LE: loop exit
PB: predicated region body
PF: predicated region fallthrough
CT: control target
= control target key end

     0   :  { %vm28_vm0 = vcmask 31744   ;;  %vm31_vm1 = vcmask 261120   ;;  %s111_s1 = inlined_call_operand.vmem [shape: f32[32,4], index: 1, kind: input, shape index: {}]   ;;  %s112_s2 = inlined_call_operand.vmem [shape: f32[1,4], index: 2, kind: input, shape index: {}]   ;;  %s113_s3 = inlined_call_operand.vmem [shape: f32[8,4], index: 3, kind: output, shape index: {}]   ;;  %s114_s0 = inlined_call_operand.vmem [shape: f32[8,32], index: 0, kind: input, shape index: {}]  }
   0x1   :  { %v18_v0 = vld [vmem:[%s111_s1 + $0x18] sm:$0xff]  ;;  %v17_v1 = vld [vmem:[%s111_s1 + $0x10] sm:$0xff]  ;;  %v16_v2 = vld [vmem:[%s111_s1 + $0x8] sm:$0xff] }
   0x2   :  { %47 = vmatpush.msra.mxu0 %v18_v0  ;;  %v63_v3 = vld [vmem:[%s112_s2] ss:$0 sm:$0xff] }
   0x3   :  { %v15_v4 = vld [vmem:[%s111_s1] sm:$0xff]  ;;  %29 = vst.msk [vmem:[%s113_s3] sm:$0xff] %vm28_vm0, %v63_v3 }
   0x4   :  { %48 = vmatpush.msra.mxu0 %v17_v1  ;;  %v14_v5 = vld [vmem:[%s114_s0] sm:$0xff] }
   0x6   :  { %49 = vmatpush.msra.mxu0 %v16_v2 }
   0x8   :  { %50 = vmatpush.msra.mxu0 %v15_v4 }
   0x9   :  { %62 = vmatmul.msk.f32.vlgmr.msra.gmra.mxu0 %vm31_vm1, %v14_v5 }
   0xa   :  { %v30_v6 = vld [vmem:[%s113_s3] sm:$0xff] }
  0x86   :  { %v52_v7 = vpop.f32.mrf.mxu0 }
  0x87   :  { %v55_v8 = vadd.f32 %v52_v7, %v30_v6 }
  0x89   :  { %57 = vst.msk [vmem:[%s113_s3] sm:$0xff] %vm28_vm0, %v55_v8 }

</bundles_post_ra>
